<compile_context>
chip_gen: v6e
topology: v6e:2x2x1
jax: 0.10.0
libtpu: 0.0.40
codegen_flags: <defaults>
</compile_context>

<pallas_src>
import functools

import jax
import jax.numpy as jnp
from jax import lax
from jax.experimental import pallas as pl
from jax.experimental.pallas import tpu as pltpu

# --- small, module-consistent sizes ---------------------------------------
N_VOCAB = 16            # len(TEXT.vocab)  -> also n_classes
EMB_DIM = 32
N_CH = 4                # n_channels_per_filter
FILTER_SIZES = (3, 4, 5)
SEQ_LEN = 8
BATCH = 2
N_CLASSES = N_VOCAB
TOTAL_TAP_COLS = sum(FILTER_SIZES) * N_CH   # 48
BIAS_LANES = 128                            # lane-padded packed bias buffer


def cnn_kernel(ids_ref, wfused_ref, bias_ref, fcw_ref, out_ref, *,
               filter_sizes, n_ch, batch, seq_len, n_vocab, n_classes):
    """Whole forward in one kernel invocation.

    ids_ref   : (B*S, 1) int32            token ids (batch-major, then position)
    wfused_ref: (V, sum(fs)*C) bf16       frozen (embedding_table @ packed_conv_taps)
    bias_ref  : (1, 128) f32              [b0 | b1 | b2 | fc_b | zero-pad] on lanes
    fcw_ref   : (3, C, n_classes) bf16    fc weight, pre-transposed, one slice per branch
    out_ref   : (B, n_classes) f32        log-probabilities
    """
    B, S, V, C = batch, seq_len, n_vocab, n_ch
    total_cols = sum(filter_sizes) * C

    # ---- fused embedding lookup + all conv taps: ONE MXU matmul ---------------
    # TODO(synk): one-hot gather is O(V) in FLOPs/VMEM -- switch to a scalar-prefetched
    # row gather (PrefetchScalarGridSpec + pl.Element) at realistic vocab sizes.
    ids = ids_ref[...]                                           # (B*S, 1) int32
    iota = lax.broadcasted_iota(jnp.int32, (B * S, V), 1)        # (B*S, V)
    one_hot = (ids == iota).astype(jnp.bfloat16)                 # no f32 select / extra cast
    taps = jnp.dot(one_hot, wfused_ref[...],
                   preferred_element_type=jnp.float32)           # (B*S, 48) f32
    taps = taps.reshape(B, S, total_cols)                        # (B, S, 48)

    bias = bias_ref[...]                                         # (1, 128) f32

    def conv_relu_maxpool(col_off, fs, b):
        L = S - fs + 1
        # tap 0 initializes the accumulator (no zeros broadcast).
        # TODO(synk): if the bundle dump shows these lane slices materializing VMEM
        # copies, flatten taps to (B*S, 48) and use pltpu.roll on the sublane axis.
        acc = taps[:, 0:L, col_off:col_off + C]
        for k in range(1, fs):                                   # static unroll
            acc = acc + taps[:, k:k + L, col_off + k * C: col_off + (k + 1) * C]
        acc = jnp.maximum(acc + b[None, :, :], 0.0)              # bias + ReLU (f32)
        return jnp.max(acc, axis=1)                              # max-pool over time -> (B, C)

    offs, o = [], 0
    for fs in filter_sizes:
        offs.append(o)
        o += fs * C

    p0 = conv_relu_maxpool(offs[0], filter_sizes[0], bias[:, 0 * C:1 * C])
    p1 = conv_relu_maxpool(offs[1], filter_sizes[1], bias[:, 1 * C:2 * C])
    p2 = conv_relu_maxpool(offs[2], filter_sizes[2], bias[:, 2 * C:3 * C])
    fcb = bias[:, 3 * C:3 * C + n_classes]                       # (1, n_classes) f32

    # TODO(synk): dropout implemented as identity (inference/eval semantics);
    # no in-kernel RNG masking.

    # fc(cat([p0,p1,p2])) with weights already transposed/sliced/stacked in the wrapper.
    # (3 tiny MXU pushes vs 1 push + lane concat is ~neutral given MXU slack.)
    logits = (jnp.dot(p0.astype(jnp.bfloat16), fcw_ref[0],
                      preferred_element_type=jnp.float32)
              + jnp.dot(p1.astype(jnp.bfloat16), fcw_ref[1],
                        preferred_element_type=jnp.float32)
              + jnp.dot(p2.astype(jnp.bfloat16), fcw_ref[2],
                        preferred_element_type=jnp.float32)
              + fcb)                                             # (B, n_classes) f32

    # numerically stable log_softmax over the last dim (EUP exp/log, f32)
    m = jnp.max(logits, axis=-1, keepdims=True)
    shifted = logits - m
    lse = jnp.log(jnp.sum(jnp.exp(shifted), axis=-1, keepdims=True))
    out_ref[...] = shifted - lse


def init_params(key):
    ks = jax.random.split(key, 9)
    params = {
        # frozen "pretrained" embedding table
        'embedding': jax.random.normal(ks[0], (N_VOCAB, EMB_DIM), jnp.float32) * 0.1,
        'fc_w': jax.random.normal(ks[1], (N_CLASSES, 3 * N_CH), jnp.float32) * 0.1,
        'fc_b': jax.random.normal(ks[2], (1, N_CLASSES), jnp.float32) * 0.1,
    }
    for i, fs in enumerate(FILTER_SIZES):
        params[f'conv{i}_w'] = jax.random.normal(
            ks[3 + 2 * i], (N_CH, fs, EMB_DIM), jnp.float32) * 0.1
        params[f'conv{i}_b'] = jax.random.normal(
            ks[4 + 2 * i], (1, N_CH), jnp.float32) * 0.1
    return params


def pack_params(params):
    """One-time packing at load time (NOT on the per-call jit path).

    Returns the 3 packed weight buffers the kernel consumes:
      wfused : (V, sum(fs)*C) bf16   -- frozen table fused with all conv taps
      bias   : (1, 128) f32          -- [b0 | b1 | b2 | fc_b | pad]
      fcw    : (3, C, n_classes) bf16
    """
    C = N_CH
    cols = []
    for i, fs in enumerate(FILTER_SIZES):
        w = params[f'conv{i}_w']                        # (C, fs, E)
        for k in range(fs):
            cols.append(w[:, k, :].T)                   # (E, C)
    wpack = jnp.concatenate(cols, axis=1)               # (E, sum(fs)*C) f32
    # Fuse the frozen embedding into the conv taps: (V, E) @ (E, 48) -> (V, 48).
    wfused = (params['embedding'] @ wpack).astype(jnp.bfloat16)

    fcw = params['fc_w']                                # (n_classes, 3*C)
    fcw_stacked = jnp.stack(
        [fcw[:, i * C:(i + 1) * C].T for i in range(len(FILTER_SIZES))],
        axis=0).astype(jnp.bfloat16)                    # (3, C, n_classes)

    bias = jnp.zeros((1, BIAS_LANES), jnp.float32)
    bias = bias.at[:, 0 * C:1 * C].set(params['conv0_b'])
    bias = bias.at[:, 1 * C:2 * C].set(params['conv1_b'])
    bias = bias.at[:, 2 * C:3 * C].set(params['conv2_b'])
    bias = bias.at[:, 3 * C:3 * C + N_CLASSES].set(params['fc_b'])
    return {'wfused': wfused, 'bias': bias, 'fcw': fcw_stacked}


@jax.jit
def cnn_forward(seq, packed):
    """seq: (seq_len, batch) int32, matching the PyTorch input convention.
    packed: output of pack_params() (already cast/packed, hoisted off this path)."""
    x = seq.T                                            # permute(1, 0) -> (B, S)
    B, S = x.shape
    ids = x.reshape(B * S, 1).astype(jnp.int32)          # gather fused into the kernel

    inputs = (ids, packed['wfused'], packed['bias'], packed['fcw'])

    flops = (2 * B * S * N_VOCAB * TOTAL_TAP_COLS        # fused embed+conv matmul
             + 2 * B * 3 * N_CH * N_CLASSES)             # fc
    bytes_accessed = (sum(int(a.size) * a.dtype.itemsize for a in inputs)
                      + B * N_CLASSES * 4)

    vmem = pl.BlockSpec(memory_space=pltpu.MemorySpace.VMEM)
    kernel = functools.partial(cnn_kernel, filter_sizes=FILTER_SIZES, n_ch=N_CH,
                               batch=B, seq_len=S, n_vocab=N_VOCAB,
                               n_classes=N_CLASSES)
    return pl.pallas_call(
        kernel,
        out_shape=jax.ShapeDtypeStruct((B, N_CLASSES), jnp.float32),
        in_specs=[vmem] * len(inputs),
        out_specs=vmem,
        cost_estimate=pl.CostEstimate(flops=int(flops),
                                      transcendentals=int(B * (N_CLASSES + 1)),
                                      bytes_accessed=int(bytes_accessed)),
    )(*inputs)


def cnn_reference(seq, params):
    """Pure-JAX f32 reference with the module's math, for a correctness check."""
    x = seq.T
    emb = jnp.take(params['embedding'], x, axis=0)       # (B, S, E)
    pooled = []
    for i, fs in enumerate(FILTER_SIZES):
        w, b = params[f'conv{i}_w'], params[f'conv{i}_b']
        L = SEQ_LEN - fs + 1
        acc = jnp.zeros((x.shape[0], L, N_CH), jnp.float32)
        for k in range(fs):
            acc = acc + jnp.einsum('ble,ce->blc', emb[:, k:k + L, :], w[:, k, :])
        acc = jnp.maximum(acc + b[None, :, :], 0.0)
        pooled.append(jnp.max(acc, axis=1))
    cat = jnp.concatenate(pooled, axis=1)
    logits = cat @ params['fc_w'].T + params['fc_b']
    return jax.nn.log_softmax(logits, axis=-1)


if __name__ == "__main__":
    key = jax.random.PRNGKey(0)
    k_param, k_seq = jax.random.split(key)
    params = init_params(k_param)
    seq = jax.random.randint(k_seq, (SEQ_LEN, BATCH), 0, N_VOCAB, dtype=jnp.int32)

    # One-time weight packing (off the per-call path).
    packed = jax.block_until_ready(pack_params(params))

    out = cnn_forward(seq, packed)
    out = jax.block_until_ready(out)

    ref = cnn_reference(seq, params)
    assert out.shape == (BATCH, N_CLASSES)
    # tolerance accounts for bf16 matmul operands / fused-weight rounding in the kernel
    assert jnp.allclose(out, ref, rtol=2e-2, atol=2e-2), "mismatch vs JAX reference"

    print("KERNEL_OK")
</pallas_src>

<mosaic_0001>
module attributes {stable_mosaic.version = 11 : i64} {
  func.func @cnn_kernel(%arg0: memref<16x1xi32, #tpu.memory_space<vmem>>, %arg1: memref<16x48xbf16, #tpu.memory_space<vmem>>, %arg2: memref<1x128xf32, #tpu.memory_space<vmem>>, %arg3: memref<3x4x16xbf16, #tpu.memory_space<vmem>>, %arg4: memref<2x16xf32, #tpu.memory_space<vmem>>) attributes {dimension_semantics = [], scalar_prefetch = 0 : i64, scratch_operands = 0 : i64, tpu.core_type = #tpu.core_type<tc>} {
    %c0 = arith.constant 0 : index
    %c0_0 = arith.constant 0 : index
    %0 = vector.load %arg0[%c0, %c0_0] : memref<16x1xi32, #tpu.memory_space<vmem>>, vector<16x1xi32>
    %1 = tpu.iota {dimensions = array<i32: 1>} : vector<16x16xi32>
    %2 = vector.broadcast %0 : vector<16x1xi32> to vector<16x16xi32>
    %3 = arith.cmpi eq, %2, %1 : vector<16x16xi32>
    %4 = arith.extui %3 : vector<16x16xi1> to vector<16x16xi32>
    %5 = arith.sitofp %4 : vector<16x16xi32> to vector<16x16xf32>
    %6 = arith.truncf %5 : vector<16x16xf32> to vector<16x16xbf16>
    %c0_1 = arith.constant 0 : index
    %c0_2 = arith.constant 0 : index
    %7 = vector.load %arg1[%c0_1, %c0_2] : memref<16x48xbf16, #tpu.memory_space<vmem>>, vector<16x48xbf16>
    %cst = arith.constant dense<0.000000e+00> : vector<16x48xf32>
    %8 = tpu.matmul %6, %7, %cst {dimension_numbers = #tpu.dot_dimension_numbers<[1], [0], [0], [1], [0, 0, 1, 1], [], []>} : vector<16x16xbf16>, vector<16x48xbf16>, vector<16x48xf32> -> vector<16x48xf32>
    %9 = vector.shape_cast %8 : vector<16x48xf32> to vector<2x8x48xf32>
    %c0_3 = arith.constant 0 : index
    %c0_4 = arith.constant 0 : index
    %10 = vector.load %arg2[%c0_3, %c0_4] : memref<1x128xf32, #tpu.memory_space<vmem>>, vector<1x128xf32>
    %11 = vector.extract_strided_slice %10 {offsets = [0, 0], sizes = [1, 4], strides = [1, 1]} : vector<1x128xf32> to vector<1x4xf32>
    %12 = vector.extract_strided_slice %9 {offsets = [0, 0, 0], sizes = [2, 6, 4], strides = [1, 1, 1]} : vector<2x8x48xf32> to vector<2x6x4xf32>
    %13 = vector.extract_strided_slice %9 {offsets = [0, 1, 4], sizes = [2, 6, 4], strides = [1, 1, 1]} : vector<2x8x48xf32> to vector<2x6x4xf32>
    %14 = arith.addf %12, %13 : vector<2x6x4xf32>
    %15 = vector.extract_strided_slice %9 {offsets = [0, 2, 8], sizes = [2, 6, 4], strides = [1, 1, 1]} : vector<2x8x48xf32> to vector<2x6x4xf32>
    %16 = arith.addf %14, %15 : vector<2x6x4xf32>
    %17 = vector.shape_cast %11 : vector<1x4xf32> to vector<1x1x4xf32>
    %18 = vector.broadcast %17 : vector<1x1x4xf32> to vector<2x6x4xf32>
    %19 = arith.addf %16, %18 : vector<2x6x4xf32>
    %cst_5 = arith.constant 0.000000e+00 : f32
    %20 = vector.broadcast %cst_5 : f32 to vector<2x6x4xf32>
    %21 = arith.maximumf %19, %20 : vector<2x6x4xf32>
    %cst_6 = arith.constant dense<0xFF800000> : vector<2x4xf32>
    %22 = vector.multi_reduction <maximumf>, %21, %cst_6 [1] : vector<2x6x4xf32> to vector<2x4xf32>
    %23 = vector.extract_strided_slice %10 {offsets = [0, 4], sizes = [1, 4], strides = [1, 1]} : vector<1x128xf32> to vector<1x4xf32>
    %24 = vector.extract_strided_slice %9 {offsets = [0, 0, 12], sizes = [2, 5, 4], strides = [1, 1, 1]} : vector<2x8x48xf32> to vector<2x5x4xf32>
    %25 = vector.extract_strided_slice %9 {offsets = [0, 1, 16], sizes = [2, 5, 4], strides = [1, 1, 1]} : vector<2x8x48xf32> to vector<2x5x4xf32>
    %26 = arith.addf %24, %25 : vector<2x5x4xf32>
    %27 = vector.extract_strided_slice %9 {offsets = [0, 2, 20], sizes = [2, 5, 4], strides = [1, 1, 1]} : vector<2x8x48xf32> to vector<2x5x4xf32>
    %28 = arith.addf %26, %27 : vector<2x5x4xf32>
    %29 = vector.extract_strided_slice %9 {offsets = [0, 3, 24], sizes = [2, 5, 4], strides = [1, 1, 1]} : vector<2x8x48xf32> to vector<2x5x4xf32>
    %30 = arith.addf %28, %29 : vector<2x5x4xf32>
    %31 = vector.shape_cast %23 : vector<1x4xf32> to vector<1x1x4xf32>
    %32 = vector.broadcast %31 : vector<1x1x4xf32> to vector<2x5x4xf32>
    %33 = arith.addf %30, %32 : vector<2x5x4xf32>
    %cst_7 = arith.constant 0.000000e+00 : f32
    %34 = vector.broadcast %cst_7 : f32 to vector<2x5x4xf32>
    %35 = arith.maximumf %33, %34 : vector<2x5x4xf32>
    %cst_8 = arith.constant dense<0xFF800000> : vector<2x4xf32>
    %36 = vector.multi_reduction <maximumf>, %35, %cst_8 [1] : vector<2x5x4xf32> to vector<2x4xf32>
    %37 = vector.extract_strided_slice %10 {offsets = [0, 8], sizes = [1, 4], strides = [1, 1]} : vector<1x128xf32> to vector<1x4xf32>
    %38 = vector.extract_strided_slice %9 {offsets = [0, 0, 28], sizes = [2, 4, 4], strides = [1, 1, 1]} : vector<2x8x48xf32> to vector<2x4x4xf32>
    %39 = vector.extract_strided_slice %9 {offsets = [0, 1, 32], sizes = [2, 4, 4], strides = [1, 1, 1]} : vector<2x8x48xf32> to vector<2x4x4xf32>
    %40 = arith.addf %38, %39 : vector<2x4x4xf32>
    %41 = vector.extract_strided_slice %9 {offsets = [0, 2, 36], sizes = [2, 4, 4], strides = [1, 1, 1]} : vector<2x8x48xf32> to vector<2x4x4xf32>
    %42 = arith.addf %40, %41 : vector<2x4x4xf32>
    %43 = vector.extract_strided_slice %9 {offsets = [0, 3, 40], sizes = [2, 4, 4], strides = [1, 1, 1]} : vector<2x8x48xf32> to vector<2x4x4xf32>
    %44 = arith.addf %42, %43 : vector<2x4x4xf32>
    %45 = vector.extract_strided_slice %9 {offsets = [0, 4, 44], sizes = [2, 4, 4], strides = [1, 1, 1]} : vector<2x8x48xf32> to vector<2x4x4xf32>
    %46 = arith.addf %44, %45 : vector<2x4x4xf32>
    %47 = vector.shape_cast %37 : vector<1x4xf32> to vector<1x1x4xf32>
    %48 = vector.broadcast %47 : vector<1x1x4xf32> to vector<2x4x4xf32>
    %49 = arith.addf %46, %48 : vector<2x4x4xf32>
    %cst_9 = arith.constant 0.000000e+00 : f32
    %50 = vector.broadcast %cst_9 : f32 to vector<2x4x4xf32>
    %51 = arith.maximumf %49, %50 : vector<2x4x4xf32>
    %cst_10 = arith.constant dense<0xFF800000> : vector<2x4xf32>
    %52 = vector.multi_reduction <maximumf>, %51, %cst_10 [1] : vector<2x4x4xf32> to vector<2x4xf32>
    %53 = vector.extract_strided_slice %10 {offsets = [0, 12], sizes = [1, 16], strides = [1, 1]} : vector<1x128xf32> to vector<1x16xf32>
    %54 = arith.truncf %22 : vector<2x4xf32> to vector<2x4xbf16>
    %c0_11 = arith.constant 0 : index
    %c0_12 = arith.constant 0 : index
    %c0_13 = arith.constant 0 : index
    %55 = vector.load %arg3[%c0_11, %c0_12, %c0_13] : memref<3x4x16xbf16, #tpu.memory_space<vmem>>, vector<1x4x16xbf16>
    %56 = vector.shape_cast %55 : vector<1x4x16xbf16> to vector<4x16xbf16>
    %cst_14 = arith.constant dense<0.000000e+00> : vector<2x16xf32>
    %57 = tpu.matmul %54, %56, %cst_14 {dimension_numbers = #tpu.dot_dimension_numbers<[1], [0], [0], [1], [0, 0, 1, 1], [], []>} : vector<2x4xbf16>, vector<4x16xbf16>, vector<2x16xf32> -> vector<2x16xf32>
    %58 = arith.truncf %36 : vector<2x4xf32> to vector<2x4xbf16>
    %c1 = arith.constant 1 : index
    %c0_15 = arith.constant 0 : index
    %c0_16 = arith.constant 0 : index
    %59 = vector.load %arg3[%c1, %c0_15, %c0_16] : memref<3x4x16xbf16, #tpu.memory_space<vmem>>, vector<1x4x16xbf16>
    %60 = vector.shape_cast %59 : vector<1x4x16xbf16> to vector<4x16xbf16>
    %cst_17 = arith.constant dense<0.000000e+00> : vector<2x16xf32>
    %61 = tpu.matmul %58, %60, %cst_17 {dimension_numbers = #tpu.dot_dimension_numbers<[1], [0], [0], [1], [0, 0, 1, 1], [], []>} : vector<2x4xbf16>, vector<4x16xbf16>, vector<2x16xf32> -> vector<2x16xf32>
    %62 = arith.addf %57, %61 : vector<2x16xf32>
    %63 = arith.truncf %52 : vector<2x4xf32> to vector<2x4xbf16>
    %c2 = arith.constant 2 : index
    %c0_18 = arith.constant 0 : index
    %c0_19 = arith.constant 0 : index
    %64 = vector.load %arg3[%c2, %c0_18, %c0_19] : memref<3x4x16xbf16, #tpu.memory_space<vmem>>, vector<1x4x16xbf16>
    %65 = vector.shape_cast %64 : vector<1x4x16xbf16> to vector<4x16xbf16>
    %cst_20 = arith.constant dense<0.000000e+00> : vector<2x16xf32>
    %66 = tpu.matmul %63, %65, %cst_20 {dimension_numbers = #tpu.dot_dimension_numbers<[1], [0], [0], [1], [0, 0, 1, 1], [], []>} : vector<2x4xbf16>, vector<4x16xbf16>, vector<2x16xf32> -> vector<2x16xf32>
    %67 = arith.addf %62, %66 : vector<2x16xf32>
    %68 = vector.broadcast %53 : vector<1x16xf32> to vector<2x16xf32>
    %69 = arith.addf %67, %68 : vector<2x16xf32>
    %cst_21 = arith.constant dense<0xFF800000> : vector<2xf32>
    %70 = vector.multi_reduction <maximumf>, %69, %cst_21 [1] : vector<2x16xf32> to vector<2xf32>
    %71 = vector.shape_cast %70 : vector<2xf32> to vector<2x1xf32>
    %72 = vector.broadcast %71 : vector<2x1xf32> to vector<2x16xf32>
    %73 = arith.subf %69, %72 : vector<2x16xf32>
    %74 = math.exp %73 : vector<2x16xf32>
    %cst_22 = arith.constant dense<0.000000e+00> : vector<2xf32>
    %75 = vector.multi_reduction <add>, %74, %cst_22 [1] : vector<2x16xf32> to vector<2xf32>
    %76 = vector.shape_cast %75 : vector<2xf32> to vector<2x1xf32>
    %77 = math.log %76 : vector<2x1xf32>
    %78 = vector.broadcast %77 : vector<2x1xf32> to vector<2x16xf32>
    %79 = arith.subf %73, %78 : vector<2x16xf32>
    %c0_23 = arith.constant 0 : index
    %c0_24 = arith.constant 0 : index
    %80 = vector.load %arg4[%c0_23, %c0_24] : memref<2x16xf32, #tpu.memory_space<vmem>>, vector<2x16xf32>
    tpu.vector_store %arg4[%c0_23, %c0_24], %79 {strides = array<i32>} : memref<2x16xf32, #tpu.memory_space<vmem>>, vector<2x16xf32>,
    return
  }
}

</mosaic_0001>

<bundles_post_ra>
// kernel: cnn_forward.1
= control target key start
LH: loop header
LB: loop body
LE: loop exit
PB: predicated region body
PF: predicated region fallthrough
CT: control target
= control target key end

     0   :  { %v489_v1 = vmov 0   ;;  %v490_v2 = vmov 0.0   ;;  %s590_s0 = inlined_call_operand.vmem [shape: s32[16,1], index: 0, kind: input, shape index: {}]   ;;  %s591_s1 = inlined_call_operand.vmem [shape: bf16[16,48], index: 1, kind: input, shape index: {}]   ;;  %s592_s2 = inlined_call_operand.vmem [shape: f32[1,128], index: 2, kind: input, shape index: {}]   ;;  %s593_s3 = inlined_call_operand.vmem [shape: bf16[3,4,16], index: 3, kind: input, shape index: {}]   ;;  %s594_s4 = inlined_call_operand.hbm [shape: f32[2,16], index: 4, kind: output, shape index: {}]  }
   0x1   :  { %v19_v0 = vld [vmem:[%s590_s0] sm:$0xff]  ;;  %461 = vset.pattern.permute.xlu0 %v489_v1  ;;  %426 = vmatprep.subr.bf16.mxu0 %v490_v2 }
   0x2   :  { %v462_v3 = vld [vmem:[%s591_s1] sm:$0xff]  }
   0x3   :  { %9 = vsyncpa [#allocation3], 0  ;;  %24 = vperm.xlu0 %461, %v19_v0   ;;  %432 = vmatprep.subr.bf16.mxu1 %v490_v2  ;;  %v20_v4 = vld [vmem:[%s590_s0 + $0x8] sm:$0xff]  ;;  %vm491_vm0 = vmmov 0   ;;  %v21_v5 = vlaneseq  ;;  %vm44_vm3 = vcmask 130048   ;;  %s492_s0 = smov 120  }
   0x4   :  { %427 = vmatpush3.bf16.msra.mxu0 %v462_v3  ;;  %428 = vmatprep.mubr.msk.bf16.mxu0 %vm491_vm0, %v490_v2  ;;  %s493_s1 = smov 124   ;;  %s494_s21 = smov 116   ;;  %v549_v20 = vld [vmem:[%s592_s2] ss:$0 sm:$0xff]  ;;  %vm221_vm4 = vcmask 1041408   ;;  %vm122_vm5 = vcmask 29696  }
   0x5   :  { %438 = vmatprep.subr.bf16.mxu0 %v490_v2  ;;  %434 = vmatprep.mubr.msk.bf16.mxu1 %vm491_vm0, %v490_v2  ;;  %v22_v6 = vand.u32 127, %v21_v5  ;;  %s495_s24 = smov 8   ;;  %s496_s25 = smov 112   ;;  %v203_v25 = vld [vmem:[%s593_s3] sm:$0x3]  ;;  %vm154_vm6 = vcmask 127072  }
   0x6   :  { %v275_v26 = vsel %vm221_vm4, %v203_v25, 0  ;;  %s497_s2 = smov 20   ;;  %v413_v27 = vld [vmem:[%s593_s3 + $0x2] sm:$0x3]  ;;  %vm186_vm7 = vcmask 257248   ;;  %vm212_vm8 = vcmask 1041409  }
   0x7   :  { %27 = vperm.xlu0 %461, %v20_v4   ;;  %v223_v28 = vsel %vm221_vm4, %v413_v27, 0  ;;  %vm217_vm9 = vcmask 31744   ;;  %s498_s30 = smov 100   ;;  %vm380_vm10 = vcmask 123904  }
   0x8   :  { %433 = vmatpush3.bf16.msra.mxu1 %v223_v28 }
   0x9   :  { %444 = vmatprep.subr.bf16.mxu1 %v490_v2 }
  0x7e   :  { %v25_v7 = vpop.permute.xlu0 %24 }
  0x7f   :  { %vm29_vm1 = vcmp.eq.s32.totalorder %v25_v7, %v22_v6 }
  0x80   :  { %v408_v9 = vsel %vm29_vm1, 1.0, %v490_v2 }
  0x82   :  { %v28_v8 = vpop.permute.xlu0 %27 }
  0x83   :  { %vm30_vm2 = vcmp.eq.s32.totalorder %v28_v8, %v22_v6 }
  0x84   :  { %v409_v10 = vsel %vm30_vm2, 1.0, %v490_v2 }
  0x85   :  { %v35_v11 = vpack.c.bf16 %v409_v10, %v408_v9 }
  0x87   :  { %429 = vmatmul.mubr.msk.bf16.vlgmr.msra.gmra.mxu0 %vm44_vm3, %v35_v11 }
  0x88   :  { %440 = vmatprep.mubr.msk.bf16.mxu0 %vm491_vm0, %v490_v2  ;;  %439 = vmatpush3.bf16.msra.mxu0 %v275_v26 }
 0x147   :  { %v82_v12 = vpop.f32.mrf.mxu0 }
 0x148   :  { %v102_v13 = vrot.slane %v82_v12, 2  ;;  %v92_v14 = vrot.slane %v82_v12, 1  ;;  %v137_v17 = vrot.slane %v82_v12, 3  ;;  %v169_v24 = vrot.slane %v82_v12, 4 }
 0x149   :  { %v430_v15 = vpop.f32.mrf.mxu0 }
 0x14a   :  { %104 = vrot.lane.b32.xlu0 %v102_v13, %s492_s0  ;;  %94 = vrot.lane.b32.xlu1 %v92_v14, %s493_s1 }
 0x14b   :  { %v85_v16 = vpop.f32.mrf.mxu0 }
 0x14c   :  { %v93_v18 = vrot.slane %v85_v16, 1  ;;  %v103_v21 = vrot.slane %v85_v16, 2  ;;  %v170_v22 = vrot.slane %v85_v16, 4  ;;  %v138_v23 = vrot.slane %v85_v16, 3 }
 0x14d   :  { %v431_v19 = vpop.f32.mrf.mxu0 }
 0x14e   :  { %139 = vrot.lane.b32.xlu0 %v137_v17, %s494_s21  ;;  %96 = vrot.lane.b32.xlu1 %v93_v18, %s493_s1 }
 0x152   :  { %147 = vrot.lane.b32.xlu0 %v549_v20, %s495_s24  ;;  %106 = vrot.lane.b32.xlu1 %v103_v21, %s492_s0 }
 0x156   :  { %173 = vrot.lane.b32.xlu0 %v170_v22, %s496_s25  ;;  %141 = vrot.lane.b32.xlu1 %v138_v23, %s494_s21 }
 0x15a   :  { %171 = vrot.lane.b32.xlu1 %v169_v24, %s496_s25 }
 0x15e   :  { %179 = vrot.lane.b32.xlu1 %v549_v20, %s497_s2 }
 0x1bc   :  { %v105_v29 = vpop.permute.xlu0 %104  ;;  %v95_v30 = vpop.permute.xlu1 %94 }
 0x1bd   :  { %v100_v31 = vadd.f32 %v95_v30, %v82_v12 }
 0x1bf   :  { %v110_v32 = vadd.f32 %v105_v29, %v100_v31 }
 0x1c0   :  { %v140_v33 = vpop.permute.xlu0 %139  ;;  %v97_v34 = vpop.permute.xlu1 %96 }
 0x1c1   :  { %v118_v35 = vadd.f32 %v549_v20, %v110_v32  ;;  %v145_v37 = vadd.f32 %v140_v33, %v110_v32  ;;  %v101_v38 = vadd.f32 %v97_v34, %v85_v16 }
 0x1c3   :  { %v120_v36 = vmax.f32 %v118_v35, 0.0 }
 0x1c4   :  { %v148_v39 = vpop.permute.xlu0 %147  ;;  %v107_v40 = vpop.permute.xlu1 %106 }
 0x1c5   :  { %v150_v41 = vadd.f32 %v148_v39, %v145_v37  ;;  %v123_v42 = vsel %vm122_vm5, %v120_v36, -inf  ;;  %v111_v43 = vadd.f32 %v107_v40, %v101_v38 }
 0x1c6   :  { %v124_v44 = vrot.slane %v123_v42, 4 }
 0x1c7   :  { %v152_v45 = vmax.f32 %v150_v41, 0.0  ;;  %v119_v46 = vadd.f32 %v549_v20, %v111_v43 }
 0x1c8   :  { %v125_v47 = vmax.f32 %v123_v42, %v124_v44  ;;  %v142_v48 = vpop.permute.xlu1 %141  ;;  %v174_v0 = vpop.permute.xlu0 %173 }
 0x1c9   :  { %v155_v49 = vsel %vm154_vm6, %v152_v45, -inf  ;;  %v121_v50 = vmax.f32 %v119_v46, 0.0  ;;  %v146_v51 = vadd.f32 %v142_v48, %v111_v43 }
 0x1ca   :  { %v156_v52 = vrot.slane %v155_v49, 4  ;;  %v126_v53 = vrot.slane %v125_v47, 2 }
 0x1cb   :  { %v130_v54 = vsel %vm122_vm5, %v121_v50, -inf  ;;  %v151_v55 = vadd.f32 %v148_v39, %v146_v51  ;;  %v178_v3 = vadd.f32 %v174_v0, %v146_v51 }
 0x1cc   :  { %v157_v56 = vmax.f32 %v155_v49, %v156_v52  ;;  %v127_v57 = vmax.f32 %v125_v47, %v126_v53  ;;  %v131_v58 = vrot.slane %v130_v54, 4  ;;  %v172_v59 = vpop.permute.xlu1 %171 }
 0x1cd   :  { %v153_v60 = vmax.f32 %v151_v55, 0.0  ;;  %v177_v4 = vadd.f32 %v172_v59, %v145_v37 }
 0x1ce   :  { %v158_v61 = vrot.slane %v157_v56, 2  ;;  %v128_v62 = vrot.slane %v127_v57, 1  ;;  %v132_v63 = vmax.f32 %v130_v54, %v131_v58 }
 0x1cf   :  { %v162_v1 = vsel %vm154_vm6, %v153_v60, -inf }
 0x1d0   :  { %v159_v5 = vmax.f32 %v157_v56, %v158_v61  ;;  %v133_v6 = vrot.slane %v132_v63, 2  ;;  %v163_v7 = vrot.slane %v162_v1, 4  ;;  %v180_v8 = vpop.permute.xlu1 %179  ;;  %v129_v9 = vmax.f32 %v127_v57, %v128_v62  ;;  %v416_v57 = vld [vmem:[%s593_s3 + $0x4] sm:$0x3]  ;;  %s499_s3 = smov [#allocation2]  }
 0x1d1   :  { %v182_v10 = vadd.f32 %v180_v8, %v177_v4  ;;  %v183_v11 = vadd.f32 %v180_v8, %v178_v3  ;;  %v333_v58 = vsel %vm221_vm4, %v416_v57, 0  ;;  %s400_s7 = sshll.u32 %s499_s3, 4  ;;  %s401_s7 = int_to_ptr.vmem [resolvable:$true] %s400_s7 }
 0x1d2   :  { %v160_v12 = vrot.slane %v159_v5, 1  ;;  %v134_v13 = vmax.f32 %v132_v63, %v133_v6  ;;  %v164_v14 = vmax.f32 %v162_v1, %v163_v7  ;;  %v201_v21 = vpack.c.bf16 %v129_v9, %v129_v9  ;;  %s467_s8 = scalar_lea.vmem %s401_s7, 32  ;;  %p472_p1 = scmp.lt.s32.totalorder %s401_s7, %s401_s7 }
 0x1d3   :  { %v184_v15 = vmax.f32 %v182_v10, 0.0  ;;  %v185_v16 = vmax.f32 %v183_v11, 0.0  ;;  %p468_p0 = scmp.ne.s32.totalorder %s401_s7, %s467_s8  ;;  %p473_p2 = scmp.lt.s32.totalorder %s467_s8, %s467_s8 }
 0x1d4   :  { %v135_v17 = vrot.slane %v134_v13, 1  ;;  %v165_v18 = vrot.slane %v164_v14, 2  ;;  %v161_v19 = vmax.f32 %v159_v5, %v160_v12  ;;  %v267_v32 = vunpack.c.l.b16 %v201_v21 }
 0x1d5   :  { %v187_v22 = vsel %vm186_vm7, %v184_v15, -inf  ;;  %v194_v23 = vsel %vm186_vm7, %v185_v16, -inf  ;;  %p474_p3 = por %p473_p2, %p472_p1 }
 0x1d6   :  { %v136_v24 = vmax.f32 %v134_v13, %v135_v17  ;;  %v166_v25 = vmax.f32 %v164_v14, %v165_v18  ;;  %v188_v26 = vrot.slane %v187_v22, 4  ;;  %v195_v27 = vrot.slane %v194_v23, 4 }
 0x1d7   :  { %v204_v33 = vpack.c.bf16 %v161_v19, %v161_v19  ;;  %p475_p4 = pnand %p474_p3, %p468_p0 }
 0x1d8   :  { %v202_v28 = vpack.c.bf16 %v136_v24, %v136_v24  ;;  %v167_v29 = vrot.slane %v166_v25, 1  ;;  %v189_v30 = vmax.f32 %v187_v22, %v188_v26  ;;  %v196_v31 = vmax.f32 %v194_v23, %v195_v27 }
 0x1d9   :  { %v210_v45 = vunpack.c.l.b16 %v204_v33 }
 0x1da   :  { %v268_v34 = vunpack.c.l.b16 %v202_v28  ;;  %v190_v35 = vrot.slane %v189_v30, 2  ;;  %v197_v36 = vrot.slane %v196_v31, 2  ;;  %v168_v37 = vmax.f32 %v166_v25, %v167_v29 }
 0x1dc   :  { %v191_v38 = vmax.f32 %v189_v30, %v190_v35  ;;  %v198_v39 = vmax.f32 %v196_v31, %v197_v36  ;;  %v269_v40 = vsel %vm212_vm8, %v268_v34, %v267_v32  ;;  %v205_v41 = vpack.c.bf16 %v168_v37, %v168_v37 }
 0x1dd   :  { %v270_v42 = vpack.c.b16 %v269_v40, %v269_v40 }
 0x1de   :  { %v192_v43 = vrot.slane %v191_v38, 1  ;;  %v199_v44 = vrot.slane %v198_v39, 1  ;;  %v211_v46 = vunpack.c.l.b16 %v205_v41 }
 0x1df   :  { %441 = vmatmul.mubr.msk.bf16.vlgmr.msra.gmra.mxu0 %vm217_vm9, %v270_v42 }
 0x1e0   :  { %v193_v47 = vmax.f32 %v191_v38, %v192_v43  ;;  %v200_v48 = vmax.f32 %v198_v39, %v199_v44  ;;  %v213_v49 = vsel %vm212_vm8, %v211_v46, %v210_v45 }
 0x1e1   :  { %v214_v50 = vpack.c.b16 %v213_v49, %v213_v49 }
 0x1e2   :  { %v317_v51 = vpack.c.bf16 %v193_v47, %v193_v47  ;;  %v318_v52 = vpack.c.bf16 %v200_v48, %v200_v48 }
 0x1e3   :  { %215 = vrot.lane.b32.xlu0 %v214_v50, %s494_s21 }
 0x1e4   :  { %v323_v53 = vunpack.c.l.b16 %v317_v51  ;;  %v324_v54 = vunpack.c.l.b16 %v318_v52 }
 0x1e6   :  { %v325_v55 = vsel %vm212_vm8, %v324_v54, %v323_v53 }
 0x1e7   :  { %v326_v56 = vpack.c.b16 %v325_v55, %v325_v55  ;;  %376 = vrot.lane.b32.xlu0 %v549_v20, %s494_s21 }
 0x1e9   :  { %327 = vrot.lane.b32.xlu1 %v326_v56, %s498_s30 }
 0x255   :  { %v216_v59 = vpop.permute.xlu0 %215 }
 0x256   :  { %435 = vmatmul.mubr.msk.bf16.vlgmr.msra.gmra.mxu1 %vm217_vm9, %v216_v59 }
 0x257   :  { %445 = vmatpush3.bf16.msra.mxu1 %v333_v58  ;;  %446 = vmatprep.mubr.msk.bf16.mxu1 %vm491_vm0, %v490_v2 }
 0x259   :  { %v377_v7 = vpop.permute.xlu0 %376 }
 0x25b   :  { %v328_v60 = vpop.permute.xlu1 %327 }
 0x25e   :  { %447 = vmatmul.mubr.msk.bf16.vlgmr.msra.gmra.mxu1 %vm217_vm9, %v328_v60 }
 0x29f   :  { %v311_v61 = vpop.f32.mrf.mxu0 }
 0x2a1   :  { %v442_v20 = vpop.f32.mrf.mxu0 }
 0x2a3   :  { %v314_v62 = vpop.f32.mrf.mxu0 }
 0x2a5   :  { %v443_v63 = vpop.f32.mrf.mxu0 }
 0x316   :  { %v259_v0 = vpop.f32.mrf.mxu1 }
 0x317   :  { %v312_v5 = vadd.f32 %v311_v61, %v259_v0 }
 0x318   :  { %v436_v1 = vpop.f32.mrf.mxu1 }
 0x31a   :  { %v262_v3 = vpop.f32.mrf.mxu1 }
 0x31c   :  { %v437_v4 = vpop.f32.mrf.mxu1 }
 0x31e   :  { %v369_v6 = vpop.f32.mrf.mxu1 }
 0x31f   :  { %v375_v8 = vadd.f32 %v369_v6, %v312_v5 }
 0x320   :  { %v448_v9 = vpop.f32.mrf.mxu1 }
 0x321   :  { %v379_v10 = vadd.f32 %v377_v7, %v375_v8 }
 0x322   :  { %v372_v11 = vpop.f32.mrf.mxu1 }
 0x323   :  { %v381_v2 = vsel %vm380_vm10, %v379_v10, -inf }
 0x324   :  { %v449_v12 = vpop.f32.mrf.mxu1  ;;  %382 = vmax.xlane.f32.xlu1 %v381_v2 }
 0x3ad   :  { %v383_v13 = vpop.xlane.xlu1 %382 }
 0x3ae   :  { %v384_v14 = vsub.f32 %v379_v10, %v383_v13 }
 0x3b0   :  { %v385_v15 = vmul.f32 1.442695, %v384_v14 }
 0x3b2   :  { %463 = vpow2.f32 %v385_v15 }
 0x3bf   :  { %v464_v16 = vpop.eup %463 }
 0x3c0   :  { %v387_v17 = vsel %vm380_vm10, %v464_v16, 0.0 }
 0x3c1   :  { %388 = vadd.xlane.f32.xlu0 %v387_v17 }
 0x44a   :  { %v389_v18 = vpop.xlane.xlu0 %388 }
 0x44b   :  { %465 = vlog2.f32 %v389_v18 }
 0x458   :  { %v466_v19 = vpop.eup %465 }
 0x459   :  { %v391_v21 = vmul.f32 0.6931472, %v466_v19 }
 0x45b   :  { %v392_v22 = vsub.f32 %v384_v14, %v391_v21 }
 0x45d   :  { %393 = vst.msk [vmem:[#allocation2] sm:$0x3] %vm380_vm10, %v392_v22 }
 0x45e   :  { %478 = shalt.err (!%p475_p4)
}
 0x45f   :  { %403 = dma.vmem_to_hbm [thread:$0]  %s401_s7, 32, %s594_s4, [#allocation3]  }
 0x460   :  { %487 = dma.done.wait [#allocation3], 32  }
 0x461   :  { %488 = vsyncadd [#allocation3], 4294967264 }
 0x462   :  { %407 = vsyncpa [#allocation3], 1 }

</bundles_post_ra>
